<compile_context>
chip_gen: v5e
topology: v5e:2x2
jax: 0.10.0
libtpu: 0.0.40
codegen_flags: <defaults>
</compile_context>

<pallas_src>
import functools

import jax
import jax.numpy as jnp
from jax import lax
from jax.experimental import pallas as pl
from jax.experimental.pallas import tpu as pltpu


def _fdr_kernel(x_ref, w_ref, b_ref, a_ref, o_ref, *, H, W):
    """Fused conv3x3 + folded-BN + PReLU for one image.

    x_ref: (1, Cin, P)      zero-padded flat input rows, P >= H*W + 2*W + 2
    w_ref: (9, Cout, Cin)   conv weights with BN scale folded, tap t = kh*3+kw
    b_ref: (Cout, 1)        folded BN bias
    a_ref: (Cout, 1)        PReLU per-channel slope
    o_ref: (1, Cout, H*W)   output: channels-first, flattened spatial on lanes
    """
    HW = H * W
    Cout = o_ref.shape[1]

    # Column index of every flattened spatial position; masks the horizontal
    # taps that would otherwise wrap across image rows.  Computed once.
    w_idx = lax.broadcasted_iota(jnp.int32, (1, HW), 1) % W
    mask_left = w_idx >= 1           # valid positions for the dw = -1 taps
    mask_right = w_idx < W - 1       # valid positions for the dw = +1 taps

    acc = jnp.zeros((Cout, HW), jnp.float32)
    for j, dw in enumerate((-1, 0, 1)):               # horizontal tap offset
        part = jnp.zeros((Cout, HW), jnp.float32)
        for i, dh in enumerate((-1, 0, 1)):           # vertical tap offset
            # Static lane offset into the padded flat rows such that
            # patch[:, h*W + w] == x[:, h+dh, w+dw]; vertical out-of-range
            # positions land in the zero padding, horizontal wrap is masked.
            off = (dh + 1) * W + dw + 1
            patch = x_ref[0, :, pl.ds(off, HW)]       # (Cin, HW), lane-dense
            part = part + jnp.dot(w_ref[i * 3 + j], patch,
                                  preferred_element_type=jnp.float32)
        if dw == -1:
            part = jnp.where(mask_left, part, 0.0)
        elif dw == 1:
            part = jnp.where(mask_right, part, 0.0)
        acc = acc + part

    z = acc + b_ref[...]                              # folded BN bias
    out = jnp.where(z >= 0.0, z, a_ref[...] * z)      # per-channel PReLU
    o_ref[0] = out.astype(o_ref.dtype)


def fdr_forward(x_nchw, params, *, eps=1e-5):
    """Pallas implementation of FDRModule.forward (NCHW in, NCHW out)."""
    B, Cin, H, W = x_nchw.shape
    w = params["conv_w"].astype(jnp.float32)          # (Cout, Cin, 3, 3)
    Cout = w.shape[0]

    # Fold BatchNorm (running stats) into the conv weights and a bias.
    # TODO(synk): training-mode BatchNorm (batch statistics + running-stat
    # updates) is not implemented; BN is applied in inference form.
    s = params["bn_gamma"].astype(jnp.float32) / jnp.sqrt(
        params["bn_var"].astype(jnp.float32) + eps)
    w_taps = jnp.transpose(w * s[:, None, None, None], (2, 3, 0, 1))
    w_taps = w_taps.reshape(9, Cout, Cin)             # tap t = kh*3 + kw
    bias = (params["bn_beta"].astype(jnp.float32)
            - params["bn_mean"].astype(jnp.float32) * s).reshape(Cout, 1)
    alpha = params["prelu_w"].astype(jnp.float32).reshape(Cout, 1)

    # Flatten spatial and zero-pad one image row (+1 element) on each side so
    # every 3x3 tap becomes a static, in-bounds lane window of length H*W.
    HW = H * W
    lead = W + 1
    padded = pl.cdiv(HW + 2 * W + 2, 128) * 128
    xp = jnp.pad(x_nchw.astype(jnp.float32).reshape(B, Cin, HW),
                 ((0, 0), (0, 0), (lead, padded - lead - HW)))

    # Note: for production-sized images, tile H*W over a second grid axis with
    # a one-row halo to respect v7x's smaller (64 MiB) VMEM.
    out = pl.pallas_call(
        functools.partial(_fdr_kernel, H=H, W=W),
        out_shape=jax.ShapeDtypeStruct((B, Cout, HW), jnp.float32),
        grid=(B,),
        in_specs=[
            pl.BlockSpec((1, Cin, padded), lambda b: (b, 0, 0)),
            pl.BlockSpec((9, Cout, Cin), lambda b: (0, 0, 0)),
            pl.BlockSpec((Cout, 1), lambda b: (0, 0)),
            pl.BlockSpec((Cout, 1), lambda b: (0, 0)),
        ],
        out_specs=pl.BlockSpec((1, Cout, HW), lambda b: (b, 0, 0)),
        compiler_params=pltpu.CompilerParams(
            dimension_semantics=("parallel",)),
    )(xp, w_taps, bias, alpha)

    return out.reshape(B, Cout, H, W)


def _reference_forward(x, params, *, eps=1e-5):
    """Pure-JAX reference (same math, inference-mode BN) for correctness."""
    y = lax.conv_general_dilated(
        x, params["conv_w"], window_strides=(1, 1),
        padding=((1, 1), (1, 1)),
        dimension_numbers=("NCHW", "OIHW", "NCHW"))
    s = params["bn_gamma"] / jnp.sqrt(params["bn_var"] + eps)
    b = params["bn_beta"] - params["bn_mean"] * s
    y = y * s[None, :, None, None] + b[None, :, None, None]
    a = params["prelu_w"][None, :, None, None]
    return jnp.where(y >= 0.0, y, a * y)


if __name__ == "__main__":
    B, Cin, Cout, H, W = 2, 4, 8, 16, 16

    key = jax.random.PRNGKey(0)
    ks = jax.random.split(key, 7)
    params = {
        "conv_w":   0.2 * jax.random.normal(ks[0], (Cout, Cin, 3, 3), jnp.float32),
        "bn_gamma": jax.random.uniform(ks[1], (Cout,), jnp.float32, 0.5, 1.5),
        "bn_beta":  0.1 * jax.random.normal(ks[2], (Cout,), jnp.float32),
        "bn_mean":  0.1 * jax.random.normal(ks[3], (Cout,), jnp.float32),
        "bn_var":   jax.random.uniform(ks[4], (Cout,), jnp.float32, 0.5, 1.5),
        "prelu_w":  jax.random.uniform(ks[5], (Cout,), jnp.float32, 0.05, 0.45),
    }
    x = jax.random.normal(ks[6], (B, Cin, H, W), jnp.float32)

    out = jax.block_until_ready(fdr_forward(x, params))
    ref = _reference_forward(x, params)

    assert out.shape == (B, Cout, H, W), out.shape
    max_err = float(jnp.max(jnp.abs(out - ref)))
    assert jnp.allclose(out, ref, rtol=1e-4, atol=1e-4), max_err
    print("KERNEL_OK")
</pallas_src>

<mosaic_0001>
module attributes {stable_mosaic.version = 11 : i64} {
  func.func @_fdr_kernel(%arg0: i32, %arg1: memref<1x4x384xf32, #tpu.memory_space<vmem>>, %arg2: memref<9x8x4xf32, #tpu.memory_space<vmem>>, %arg3: memref<8x1xf32, #tpu.memory_space<vmem>>, %arg4: memref<8x1xf32, #tpu.memory_space<vmem>>, %arg5: memref<1x8x256xf32, #tpu.memory_space<vmem>>) attributes {dimension_semantics = [#tpu.dimension_semantics<parallel>], iteration_bounds = array<i64: 2>, scalar_prefetch = 0 : i64, scratch_operands = 0 : i64, tpu.core_type = #tpu.core_type<tc>, window_params = [{transform_indices = @transform_0, window_bounds = array<i64: 1, 4, 384>}, {pipeline_mode = #tpu.pipeline_mode<synchronous>, transform_indices = @transform_1, window_bounds = array<i64: 9, 8, 4>}, {pipeline_mode = #tpu.pipeline_mode<synchronous>, transform_indices = @transform_2, window_bounds = array<i64: 8, 1>}, {pipeline_mode = #tpu.pipeline_mode<synchronous>, transform_indices = @transform_3, window_bounds = array<i64: 8, 1>}, {transform_indices = @transform_4, window_bounds = array<i64: 1, 8, 256>}]} {
    %0 = tpu.iota {dimensions = array<i32: 1>} : vector<1x256xi32>
    %c16_i32 = arith.constant 16 : i32
    %c0_i32 = arith.constant 0 : i32
    %1 = arith.cmpi eq, %c16_i32, %c0_i32 : i32
    %c1_i32 = arith.constant 1 : i32
    %2 = arith.select %1, %c1_i32, %c16_i32 : i32
    %3 = vector.broadcast %2 : i32 to vector<1x256xi32>
    %4 = arith.remsi %0, %3 : vector<1x256xi32>
    %c0_i32_0 = arith.constant 0 : i32
    %5 = vector.broadcast %c0_i32_0 : i32 to vector<1x256xi32>
    %6 = arith.cmpi ne, %4, %5 : vector<1x256xi32>
    %c0_i32_1 = arith.constant 0 : i32
    %7 = vector.broadcast %c0_i32_1 : i32 to vector<1x256xi32>
    %8 = arith.cmpi slt, %4, %7 : vector<1x256xi32>
    %c0_i32_2 = arith.constant 0 : i32
    %9 = arith.cmpi slt, %2, %c0_i32_2 : i32
    %10 = vector.broadcast %9 : i1 to vector<1x256xi1>
    %11 = vector.broadcast %10 : vector<1x256xi1> to vector<1x256xi1>
    %12 = arith.xori %8, %11 : vector<1x256xi1>
    %13 = arith.andi %12, %6 : vector<1x256xi1>
    %14 = vector.broadcast %2 : i32 to vector<1x256xi32>
    %15 = arith.addi %4, %14 : vector<1x256xi32>
    %16 = arith.select %13, %15, %4 : vector<1x256xi1>, vector<1x256xi32>
    %c1_i32_3 = arith.constant 1 : i32
    %17 = vector.broadcast %c1_i32_3 : i32 to vector<1x256xi32>
    %18 = arith.cmpi sge, %16, %17 : vector<1x256xi32>
    %c15_i32 = arith.constant 15 : i32
    %19 = vector.broadcast %c15_i32 : i32 to vector<1x256xi32>
    %20 = arith.cmpi slt, %16, %19 : vector<1x256xi32>
    %cst = arith.constant 0.000000e+00 : f32
    %21 = vector.broadcast %cst : f32 to vector<8x256xf32>
    %cst_4 = arith.constant 0.000000e+00 : f32
    %22 = vector.broadcast %cst_4 : f32 to vector<8x256xf32>
    %c0 = arith.constant 0 : index
    %c0_5 = arith.constant 0 : index
    %c0_6 = arith.constant 0 : index
    %23 = vector.load %arg1[%c0, %c0_5, %c0_6] : memref<1x4x384xf32, #tpu.memory_space<vmem>>, vector<1x4x256xf32>
    %24 = vector.shape_cast %23 : vector<1x4x256xf32> to vector<4x256xf32>
    %c0_7 = arith.constant 0 : index
    %c0_8 = arith.constant 0 : index
    %c0_9 = arith.constant 0 : index
    %25 = vector.load %arg2[%c0_7, %c0_8, %c0_9] : memref<9x8x4xf32, #tpu.memory_space<vmem>>, vector<1x8x4xf32>
    %26 = vector.shape_cast %25 : vector<1x8x4xf32> to vector<8x4xf32>
    %cst_10 = arith.constant dense<0.000000e+00> : vector<8x256xf32>
    %27 = tpu.matmul %26, %24, %cst_10 {dimension_numbers = #tpu.dot_dimension_numbers<[1], [0], [0], [1], [0, 0, 1, 1], [], []>} : vector<8x4xf32>, vector<4x256xf32>, vector<8x256xf32> -> vector<8x256xf32>
    %28 = arith.addf %22, %27 : vector<8x256xf32>
    %c0_11 = arith.constant 0 : index
    %c0_12 = arith.constant 0 : index
    %c16 = arith.constant 16 : index
    %29 = vector.load %arg1[%c0_11, %c0_12, %c16] : memref<1x4x384xf32, #tpu.memory_space<vmem>>, vector<1x4x256xf32>
    %30 = vector.shape_cast %29 : vector<1x4x256xf32> to vector<4x256xf32>
    %c3 = arith.constant 3 : index
    %c0_13 = arith.constant 0 : index
    %c0_14 = arith.constant 0 : index
    %31 = vector.load %arg2[%c3, %c0_13, %c0_14] : memref<9x8x4xf32, #tpu.memory_space<vmem>>, vector<1x8x4xf32>
    %32 = vector.shape_cast %31 : vector<1x8x4xf32> to vector<8x4xf32>
    %cst_15 = arith.constant dense<0.000000e+00> : vector<8x256xf32>
    %33 = tpu.matmul %32, %30, %cst_15 {dimension_numbers = #tpu.dot_dimension_numbers<[1], [0], [0], [1], [0, 0, 1, 1], [], []>} : vector<8x4xf32>, vector<4x256xf32>, vector<8x256xf32> -> vector<8x256xf32>
    %34 = arith.addf %28, %33 : vector<8x256xf32>
    %c0_16 = arith.constant 0 : index
    %c0_17 = arith.constant 0 : index
    %c32 = arith.constant 32 : index
    %35 = vector.load %arg1[%c0_16, %c0_17, %c32] : memref<1x4x384xf32, #tpu.memory_space<vmem>>, vector<1x4x256xf32>
    %36 = vector.shape_cast %35 : vector<1x4x256xf32> to vector<4x256xf32>
    %c6 = arith.constant 6 : index
    %c0_18 = arith.constant 0 : index
    %c0_19 = arith.constant 0 : index
    %37 = vector.load %arg2[%c6, %c0_18, %c0_19] : memref<9x8x4xf32, #tpu.memory_space<vmem>>, vector<1x8x4xf32>
    %38 = vector.shape_cast %37 : vector<1x8x4xf32> to vector<8x4xf32>
    %cst_20 = arith.constant dense<0.000000e+00> : vector<8x256xf32>
    %39 = tpu.matmul %38, %36, %cst_20 {dimension_numbers = #tpu.dot_dimension_numbers<[1], [0], [0], [1], [0, 0, 1, 1], [], []>} : vector<8x4xf32>, vector<4x256xf32>, vector<8x256xf32> -> vector<8x256xf32>
    %40 = arith.addf %34, %39 : vector<8x256xf32>
    %cst_21 = arith.constant 0.000000e+00 : f32
    %41 = vector.shape_cast %18 : vector<1x256xi1> to vector<1x256xi1>
    %42 = vector.broadcast %41 : vector<1x256xi1> to vector<8x256xi1>
    %43 = vector.broadcast %cst_21 : f32 to vector<8x256xf32>
    %44 = arith.select %42, %40, %43 : vector<8x256xi1>, vector<8x256xf32>
    %45 = arith.addf %21, %44 : vector<8x256xf32>
    %cst_22 = arith.constant 0.000000e+00 : f32
    %46 = vector.broadcast %cst_22 : f32 to vector<8x256xf32>
    %c0_23 = arith.constant 0 : index
    %c0_24 = arith.constant 0 : index
    %c1 = arith.constant 1 : index
    %47 = vector.load %arg1[%c0_23, %c0_24, %c1] : memref<1x4x384xf32, #tpu.memory_space<vmem>>, vector<1x4x256xf32>
    %48 = vector.shape_cast %47 : vector<1x4x256xf32> to vector<4x256xf32>
    %c1_25 = arith.constant 1 : index
    %c0_26 = arith.constant 0 : index
    %c0_27 = arith.constant 0 : index
    %49 = vector.load %arg2[%c1_25, %c0_26, %c0_27] : memref<9x8x4xf32, #tpu.memory_space<vmem>>, vector<1x8x4xf32>
    %50 = vector.shape_cast %49 : vector<1x8x4xf32> to vector<8x4xf32>
    %cst_28 = arith.constant dense<0.000000e+00> : vector<8x256xf32>
    %51 = tpu.matmul %50, %48, %cst_28 {dimension_numbers = #tpu.dot_dimension_numbers<[1], [0], [0], [1], [0, 0, 1, 1], [], []>} : vector<8x4xf32>, vector<4x256xf32>, vector<8x256xf32> -> vector<8x256xf32>
    %52 = arith.addf %46, %51 : vector<8x256xf32>
    %c0_29 = arith.constant 0 : index
    %c0_30 = arith.constant 0 : index
    %c17 = arith.constant 17 : index
    %53 = vector.load %arg1[%c0_29, %c0_30, %c17] : memref<1x4x384xf32, #tpu.memory_space<vmem>>, vector<1x4x256xf32>
    %54 = vector.shape_cast %53 : vector<1x4x256xf32> to vector<4x256xf32>
    %c4 = arith.constant 4 : index
    %c0_31 = arith.constant 0 : index
    %c0_32 = arith.constant 0 : index
    %55 = vector.load %arg2[%c4, %c0_31, %c0_32] : memref<9x8x4xf32, #tpu.memory_space<vmem>>, vector<1x8x4xf32>
    %56 = vector.shape_cast %55 : vector<1x8x4xf32> to vector<8x4xf32>
    %cst_33 = arith.constant dense<0.000000e+00> : vector<8x256xf32>
    %57 = tpu.matmul %56, %54, %cst_33 {dimension_numbers = #tpu.dot_dimension_numbers<[1], [0], [0], [1], [0, 0, 1, 1], [], []>} : vector<8x4xf32>, vector<4x256xf32>, vector<8x256xf32> -> vector<8x256xf32>
    %58 = arith.addf %52, %57 : vector<8x256xf32>
    %c0_34 = arith.constant 0 : index
    %c0_35 = arith.constant 0 : index
    %c33 = arith.constant 33 : index
    %59 = vector.load %arg1[%c0_34, %c0_35, %c33] : memref<1x4x384xf32, #tpu.memory_space<vmem>>, vector<1x4x256xf32>
    %60 = vector.shape_cast %59 : vector<1x4x256xf32> to vector<4x256xf32>
    %c7 = arith.constant 7 : index
    %c0_36 = arith.constant 0 : index
    %c0_37 = arith.constant 0 : index
    %61 = vector.load %arg2[%c7, %c0_36, %c0_37] : memref<9x8x4xf32, #tpu.memory_space<vmem>>, vector<1x8x4xf32>
    %62 = vector.shape_cast %61 : vector<1x8x4xf32> to vector<8x4xf32>
    %cst_38 = arith.constant dense<0.000000e+00> : vector<8x256xf32>
    %63 = tpu.matmul %62, %60, %cst_38 {dimension_numbers = #tpu.dot_dimension_numbers<[1], [0], [0], [1], [0, 0, 1, 1], [], []>} : vector<8x4xf32>, vector<4x256xf32>, vector<8x256xf32> -> vector<8x256xf32>
    %64 = arith.addf %58, %63 : vector<8x256xf32>
    %65 = arith.addf %45, %64 : vector<8x256xf32>
    %cst_39 = arith.constant 0.000000e+00 : f32
    %66 = vector.broadcast %cst_39 : f32 to vector<8x256xf32>
    %c0_40 = arith.constant 0 : index
    %c0_41 = arith.constant 0 : index
    %c2 = arith.constant 2 : index
    %67 = vector.load %arg1[%c0_40, %c0_41, %c2] : memref<1x4x384xf32, #tpu.memory_space<vmem>>, vector<1x4x256xf32>
    %68 = vector.shape_cast %67 : vector<1x4x256xf32> to vector<4x256xf32>
    %c2_42 = arith.constant 2 : index
    %c0_43 = arith.constant 0 : index
    %c0_44 = arith.constant 0 : index
    %69 = vector.load %arg2[%c2_42, %c0_43, %c0_44] : memref<9x8x4xf32, #tpu.memory_space<vmem>>, vector<1x8x4xf32>
    %70 = vector.shape_cast %69 : vector<1x8x4xf32> to vector<8x4xf32>
    %cst_45 = arith.constant dense<0.000000e+00> : vector<8x256xf32>
    %71 = tpu.matmul %70, %68, %cst_45 {dimension_numbers = #tpu.dot_dimension_numbers<[1], [0], [0], [1], [0, 0, 1, 1], [], []>} : vector<8x4xf32>, vector<4x256xf32>, vector<8x256xf32> -> vector<8x256xf32>
    %72 = arith.addf %66, %71 : vector<8x256xf32>
    %c0_46 = arith.constant 0 : index
    %c0_47 = arith.constant 0 : index
    %c18 = arith.constant 18 : index
    %73 = vector.load %arg1[%c0_46, %c0_47, %c18] : memref<1x4x384xf32, #tpu.memory_space<vmem>>, vector<1x4x256xf32>
    %74 = vector.shape_cast %73 : vector<1x4x256xf32> to vector<4x256xf32>
    %c5 = arith.constant 5 : index
    %c0_48 = arith.constant 0 : index
    %c0_49 = arith.constant 0 : index
    %75 = vector.load %arg2[%c5, %c0_48, %c0_49] : memref<9x8x4xf32, #tpu.memory_space<vmem>>, vector<1x8x4xf32>
    %76 = vector.shape_cast %75 : vector<1x8x4xf32> to vector<8x4xf32>
    %cst_50 = arith.constant dense<0.000000e+00> : vector<8x256xf32>
    %77 = tpu.matmul %76, %74, %cst_50 {dimension_numbers = #tpu.dot_dimension_numbers<[1], [0], [0], [1], [0, 0, 1, 1], [], []>} : vector<8x4xf32>, vector<4x256xf32>, vector<8x256xf32> -> vector<8x256xf32>
    %78 = arith.addf %72, %77 : vector<8x256xf32>
    %c0_51 = arith.constant 0 : index
    %c0_52 = arith.constant 0 : index
    %c34 = arith.constant 34 : index
    %79 = vector.load %arg1[%c0_51, %c0_52, %c34] : memref<1x4x384xf32, #tpu.memory_space<vmem>>, vector<1x4x256xf32>
    %80 = vector.shape_cast %79 : vector<1x4x256xf32> to vector<4x256xf32>
    %c8 = arith.constant 8 : index
    %c0_53 = arith.constant 0 : index
    %c0_54 = arith.constant 0 : index
    %81 = vector.load %arg2[%c8, %c0_53, %c0_54] : memref<9x8x4xf32, #tpu.memory_space<vmem>>, vector<1x8x4xf32>
    %82 = vector.shape_cast %81 : vector<1x8x4xf32> to vector<8x4xf32>
    %cst_55 = arith.constant dense<0.000000e+00> : vector<8x256xf32>
    %83 = tpu.matmul %82, %80, %cst_55 {dimension_numbers = #tpu.dot_dimension_numbers<[1], [0], [0], [1], [0, 0, 1, 1], [], []>} : vector<8x4xf32>, vector<4x256xf32>, vector<8x256xf32> -> vector<8x256xf32>
    %84 = arith.addf %78, %83 : vector<8x256xf32>
    %cst_56 = arith.constant 0.000000e+00 : f32
    %85 = vector.shape_cast %20 : vector<1x256xi1> to vector<1x256xi1>
    %86 = vector.broadcast %85 : vector<1x256xi1> to vector<8x256xi1>
    %87 = vector.broadcast %cst_56 : f32 to vector<8x256xf32>
    %88 = arith.select %86, %84, %87 : vector<8x256xi1>, vector<8x256xf32>
    %89 = arith.addf %65, %88 : vector<8x256xf32>
    %c0_57 = arith.constant 0 : index
    %c0_58 = arith.constant 0 : index
    %90 = vector.load %arg3[%c0_57, %c0_58] : memref<8x1xf32, #tpu.memory_space<vmem>>, vector<8x1xf32>
    %91 = vector.broadcast %90 : vector<8x1xf32> to vector<8x256xf32>
    %92 = arith.addf %89, %91 : vector<8x256xf32>
    %cst_59 = arith.constant 0.000000e+00 : f32
    %93 = vector.broadcast %cst_59 : f32 to vector<8x256xf32>
    %94 = arith.cmpf oge, %92, %93 : vector<8x256xf32>
    %c0_60 = arith.constant 0 : index
    %c0_61 = arith.constant 0 : index
    %95 = vector.load %arg4[%c0_60, %c0_61] : memref<8x1xf32, #tpu.memory_space<vmem>>, vector<8x1xf32>
    %96 = vector.broadcast %95 : vector<8x1xf32> to vector<8x256xf32>
    %97 = arith.mulf %96, %92 : vector<8x256xf32>
    %98 = arith.select %94, %92, %97 : vector<8x256xi1>, vector<8x256xf32>
    %c0_62 = arith.constant 0 : index
    %c0_63 = arith.constant 0 : index
    %c0_64 = arith.constant 0 : index
    %99 = vector.load %arg5[%c0_62, %c0_63, %c0_64] : memref<1x8x256xf32, #tpu.memory_space<vmem>>, vector<1x8x256xf32>
    %100 = vector.shape_cast %99 : vector<1x8x256xf32> to vector<8x256xf32>
    %101 = vector.shape_cast %98 : vector<8x256xf32> to vector<1x8x256xf32>
    tpu.vector_store %arg5[%c0_62, %c0_63, %c0_64], %101 {strides = array<i32>} : memref<1x8x256xf32, #tpu.memory_space<vmem>>, vector<1x8x256xf32>,
    return
  }
  func.func @transform_0(%arg0: i32) -> (i32, i32, i32) {
    %c0_i32 = arith.constant 0 : i32
    %c0_i32_0 = arith.constant 0 : i32
    %c0_i32_1 = arith.constant 0 : i32
    return %arg0, %c0_i32, %c0_i32_0 : i32, i32, i32
  }
  func.func @transform_1(%arg0: i32) -> (i32, i32, i32) {
    %c0_i32 = arith.constant 0 : i32
    %c0_i32_0 = arith.constant 0 : i32
    %c0_i32_1 = arith.constant 0 : i32
    %c0_i32_2 = arith.constant 0 : i32
    return %c0_i32, %c0_i32_0, %c0_i32_1 : i32, i32, i32
  }
  func.func @transform_2(%arg0: i32) -> (i32, i32) {
    %c0_i32 = arith.constant 0 : i32
    %c0_i32_0 = arith.constant 0 : i32
    %c0_i32_1 = arith.constant 0 : i32
    return %c0_i32, %c0_i32_0 : i32, i32
  }
  func.func @transform_3(%arg0: i32) -> (i32, i32) {
    %c0_i32 = arith.constant 0 : i32
    %c0_i32_0 = arith.constant 0 : i32
    %c0_i32_1 = arith.constant 0 : i32
    return %c0_i32, %c0_i32_0 : i32, i32
  }
  func.func @transform_4(%arg0: i32) -> (i32, i32, i32) {
    %c0_i32 = arith.constant 0 : i32
    %c0_i32_0 = arith.constant 0 : i32
    %c0_i32_1 = arith.constant 0 : i32
    return %arg0, %c0_i32, %c0_i32_0 : i32, i32, i32
  }
}

</mosaic_0001>

<bundles_post_ra>
// kernel: tpu_custom_call.1
= control target key start
LH: loop header
LB: loop body
LE: loop exit
PB: predicated region body
PF: predicated region fallthrough
CT: control target
= control target key end

     0   :  { %9 = vsyncpa [#allocation3], 0  ;;  %s1349_s0 = inlined_call_operand.vmem [shape: f32[2,4,384], index: 0, kind: input, shape index: {}]   ;;  %s1350_s1 = inlined_call_operand.vmem [shape: f32[9,8,4], index: 1, kind: input, shape index: {}]   ;;  %s1351_s2 = inlined_call_operand.vmem [shape: f32[8,1], index: 2, kind: input, shape index: {}]   ;;  %s1352_s3 = inlined_call_operand.vmem [shape: f32[8,1], index: 3, kind: input, shape index: {}]   ;;  %s1353_s4 = inlined_call_operand.hbm [shape: f32[2,8,256], index: 4, kind: output, shape index: {}]  }
   0x1   :  { %11 = vsyncpa [#allocation3 + $0x1], 0  ;;  %s1145_s15 = smov 0   ;;  %s1147_s16 = smov 0  }
   0x2   :  { %s1149_s17 = smov 0   ;;  %s1151_s18 = smov 0  }
   0x3 LB: > { %s1166_s19 = sadd.s32 4294967295, %s1109_s18   ;;  %s940_s20 = sadd.s32 4294967294, %s1109_s18   ;;  %s1109_s18 = sphi %s1151_s18, %s1365_s18   ;;  %s1105_s17 = sphi %s1149_s17, %s1364_s17   ;;  %s1101_s16 = sphi %s1147_s16, %s1363_s16   ;;  %s1097_s15 = sphi %s1145_s15, %s1362_s15  }
   0x4   : > { %s1170_s21 = sadd.s32 1, %s1109_s18   ;;  %s113_s22 = sadd.s32 1, %s1105_s17 }
   0x5   : > { %s110_s23 = ssub.s32 %s1109_s18, %s1170_s21  ;;  %p123_p0 = scmp.ne.s32.totalorder %s1105_s17, %s1101_s16 }
   0x6   : > { %p111_p1 = scmp.eq.s32.totalorder %s110_s23, 0  ;;  %p124_p2 = scmp.eq.s32.totalorder %s1166_s19, 1 }
   0x7   : > { %p129_p3 = scmp.ne.s32.totalorder %s1101_s16, %s1097_s15  ;;  %p130_p4 = scmp.eq.s32.totalorder %s940_s20, 1 }
   0x8   : > { %s1181_s24 = scalar_select %p111_p1, %s1105_s17, %s113_s22  }
   0x9   : > { %p1183_p5 = por %p124_p2, %p123_p0  ;;  %p1187_p6 = por %p130_p4, %p129_p3 }
   0xa   : > { %p943_p7 = scmp.ge.s32.totalorder %s1109_s18, 1  ;;  %p165_p8 = scmp.lt.s32.totalorder %s1109_s18, 3 }
   0xc   : > { %p166_p9 = pnand %p943_p7, %p165_p8 }
   0xd   : > { %p191_p10 = scmp.lt.s32.totalorder (!%p166_p9), %s1166_s19, 1  ;;  %s1111_s6 = smov (!%p166_p9), 112  }
   0xe   : > { %169 = sbr.rel (%p166_p9) target bundleno = 354 (0x162), region = 36  ;;  %s1112_s7 = smov (!%p166_p9), 96  }
   0xf   : > { %s1113_s8 = smov (!%p166_p9), 111   ;;  %s1114_s9 = smov (!%p166_p9), 127  }
  0x10   : > { %s1115_s10 = smov (!%p166_p9), 95   ;;  %s1116_s11 = smov (!%p166_p9), 110  }
  0x11   : > { %s1117_s12 = smov (!%p166_p9), 126   ;;  %s1118_s13 = smov (!%p166_p9), 94  }
  0x12   : > { %s995_s30 = sshll.u32 (!%p166_p9), %s1166_s19, 4  ;;  %s1067_s20 = scalar_lea.hbm (!%p166_p9), %s1353_s4, 32 }
  0x13   : > { %s192_s27 = scalar_select %p191_p10, %s1166_s19, 1  ;;  %vm254_vm0 = vcmask 1043456   ;;  %v228_v34 = vld [vmem:[%s1350_s1] sm:$0xff]  ;;  %vm250_vm1 = vcmask 31744   ;;  %vm368_vm2 = vcmask 785408   ;;  %vm247_vm3 = vcmask 916480  }
  0x14   : > { %v946_v40 = vld [vmem:[%s1350_s1 + $0x18] sm:$0xff]  ;;  %v955_v45 = vld [vmem:[%s1350_s1 + $0x30] sm:$0xff]  ;;  %vm448_vm4 = vcmask 908288   ;;  %v961_v50 = vld [vmem:[%s1350_s1 + $0x20] sm:$0xff]  ;;  %vm510_vm5 = vcmask 1039360   ;;  %v1119_v61 = vmov 0  }
  0x15   : > { %s996_s28 = smul.u32 12, %s192_s27  ;;  %v960_v56 = vld [vmem:[%s1350_s1 + $0x8] sm:$0xff]  ;;  %v842_v59 = vld [vmem:[%s1351_s2] sm:$0xff]  ;;  %1045 = vset.pattern.permute.xlu0 %v1119_v61  ;;  %1046 = vset.pattern.permute.xlu1 %v1119_v61  ;;  %vm578_vm6 = vcmask 777216   ;;  %vm652_vm7 = vcmask 900096   ;;  %vm714_vm8 = vcmask 1031168  }
  0x16   : > { %v852_v60 = vld [vmem:[%s1352_s3] sm:$0xff]  ;;  %vm782_vm9 = vcmask 769024  }
  0x17   : > { %s1198_s5 = scalar_lea.vmem %s1349_s0, %s996_s28  ;;  %s188_s28 = sand.u32 1, %s1101_s16  }
  0x18   : > { %v1201_v0 = vld [vmem:[%s1198_s5] sm:$0xff]  ;;  %v230_v1 = vld [vmem:[%s1198_s5 + $0x8] sm:$0xf]  ;;  %s944_s29 = sshll.u32 %s188_s28, 4 }
  0x19   : > { %235 = vst [vmem:[#allocation1] ss:$2 sm:$0xff] %v1201_v0  ;;  %v351_v2 = vld [vmem:[%s1198_s5 + $0x8] sm:$0xf] }
  0x1a   : > { %237 = vst [vmem:[#allocation1 + $0x10] ss:$2 sm:$0xff] %v230_v1  ;;  %v429_v9 = vld [vmem:[%s1198_s5 + $0x8] sm:$0xf] }
  0x1b   : > { %v561_v13 = vld [vmem:[%s1198_s5 + $0x8] sm:$0xf] }
  0x1c   : > { %v633_v17 = vld [vmem:[%s1198_s5 + $0x8] sm:$0xf] }
  0x1d   : > { %v765_v24 = vld [vmem:[%s1198_s5 + $0x8] sm:$0xf] }
  0x20   : > { %v238_v3 = vld.sshfl [vmem:[#allocation1] sm:$0xff pattern:$0x75316420]  ;;  %v239_v4 = vld.sshfl [vmem:[#allocation1 + $0x8] sm:$0xff pattern:$0x75316420] }
  0x21   : > { %241 = vrot.lane.b32.xlu0 %v238_v3, %s1111_s6  ;;  %v240_v5 = vld.sshfl [vmem:[#allocation1 + $0x10] sm:$0xff pattern:$0x75316420]  ;;  %300 = vst [vmem:[#allocation1] ss:$2 sm:$0xff] %v1201_v0 }
  0x22   : > { %245 = vrot.lane.b32.xlu1 %v240_v5, %s1111_s6  ;;  %358 = vst [vmem:[#allocation1 + $0x10] ss:$2 sm:$0xff] %v351_v2 }
  0x28   : > { %v1207_v6 = vld.sshfl [vmem:[#allocation1] sm:$0xff pattern:$0x75316420]  ;;  %v1209_v7 = vld.sshfl [vmem:[#allocation1 + $0x8] sm:$0xff pattern:$0x75316420] }
  0x29   : > { %243 = vrot.lane.b32.xlu0 %v239_v4, %s1111_s6  ;;  %356 = vst [vmem:[#allocation1] ss:$2 sm:$0xff] %v1201_v0  ;;  %v361_v8 = vld.sshfl [vmem:[#allocation1 + $0x10] sm:$0xff pattern:$0x75316420]  ;;  %951 = vmatpush.msk.msra.mxu2 %vm254_vm0, %v1207_v6  ;;  %v976_v6 = vld [vmem:[%s1350_s1 + $0x28] sm:$0xff] }
  0x2a   : > { %366 = vrot.lane.b32.xlu2 %v361_v8, %s1112_s7  ;;  %438 = vst [vmem:[#allocation1 + $0x10] ss:$2 sm:$0xff] %v429_v9  ;;  %953 = vmatpush.msk.msra.mxu3 %vm254_vm0, %v1209_v7 }
  0x2b   : > { %952 = vmatmul.msk.f32.vlgmr.msra.gmra.mxu2 %vm250_vm1, %v228_v34  ;;  %954 = vmatmul.msk.f32.vlgmr.msra.gmra.mxu3 %vm250_vm1, %v228_v34 }
  0x30   : > { %v359_v10 = vld.sshfl [vmem:[#allocation1] sm:$0xff pattern:$0x75316420]  ;;  %v360_v11 = vld.sshfl [vmem:[#allocation1 + $0x8] sm:$0xff pattern:$0x75316420] }
  0x31   : > { %362 = vrot.lane.b32.xlu1 %v359_v10, %s1112_s7  ;;  %436 = vst [vmem:[#allocation1] ss:$2 sm:$0xff] %v1201_v0  ;;  %v441_v12 = vld.sshfl [vmem:[#allocation1 + $0x10] sm:$0xff pattern:$0x75316420] }
  0x32   : > { %364 = vrot.lane.b32.xlu2 %v360_v11, %s1112_s7  ;;  %500 = vst [vmem:[#allocation1 + $0x10] ss:$2 sm:$0xff] %v429_v9  ;;  %s876_s7 = scalar_lea.hbm %s1353_s4, %s995_s30 }
  0x33   : > { %s880_s19 = sshll.u32 %s876_s7, 4  ;;  %s881_s19 = int_to_ptr.hbm [resolvable:$true] %s880_s19 }
  0x38   : > { %v440_v14 = vld.sshfl [vmem:[#allocation1 + $0x8] sm:$0xff pattern:$0x75316420]  ;;  %v439_v15 = vld.sshfl [vmem:[#allocation1] sm:$0xff pattern:$0x75316420] }
  0x39   : > { %444 = vrot.lane.b32.xlu1 %v440_v14, %s1113_s8  ;;  %442 = vrot.lane.b32.xlu0 %v439_v15, %s1113_s8  ;;  %498 = vst [vmem:[#allocation1] ss:$2 sm:$0xff] %v1201_v0  ;;  %v503_v16 = vld.sshfl [vmem:[#allocation1 + $0x10] sm:$0xff pattern:$0x75316420] }
  0x3a   : > { %446 = vrot.lane.b32.xlu2 %v441_v12, %s1113_s8  ;;  %568 = vst [vmem:[#allocation1 + $0x10] ss:$2 sm:$0xff] %v561_v13  ;;  %v975_v12 = vld [vmem:[%s1350_s1 + $0x10] sm:$0xff]  ;;  %s190_s8 = scalar_lea.vmem [#allocation2], %s944_s29 }
  0x40   : > { %v502_v18 = vld.sshfl [vmem:[#allocation1 + $0x8] sm:$0xff pattern:$0x75316420]  ;;  %v501_v19 = vld.sshfl [vmem:[#allocation1] sm:$0xff pattern:$0x75316420] }
  0x41   : > { %506 = vrot.lane.b32.xlu1 %v502_v18, %s1114_s9  ;;  %504 = vrot.lane.b32.xlu0 %v501_v19, %s1114_s9  ;;  %566 = vst [vmem:[#allocation1] ss:$2 sm:$0xff] %v1201_v0  ;;  %v571_v20 = vld.sshfl [vmem:[#allocation1 + $0x10] sm:$0xff pattern:$0x75316420]  ;;  %v985_v18 = vld [vmem:[%s1350_s1 + $0x40] sm:$0xff] }
  0x42   : > { %508 = vrot.lane.b32.xlu2 %v503_v16, %s1114_s9  ;;  %642 = vst [vmem:[#allocation1 + $0x10] ss:$2 sm:$0xff] %v633_v17  ;;  %s878_s9 = sshll.u32 %s190_s8, 4  ;;  %s879_s9 = int_to_ptr.vmem [resolvable:$true] %s878_s9 }
  0x48   : > { %v570_v21 = vld.sshfl [vmem:[#allocation1 + $0x8] sm:$0xff pattern:$0x75316420]  ;;  %v569_v22 = vld.sshfl [vmem:[#allocation1] sm:$0xff pattern:$0x75316420] }
  0x49   : > { %574 = vrot.lane.b32.xlu1 %v570_v21, %s1115_s10  ;;  %572 = vrot.lane.b32.xlu0 %v569_v22, %s1115_s10  ;;  %640 = vst [vmem:[#allocation1] ss:$2 sm:$0xff] %v1201_v0  ;;  %v645_v23 = vld.sshfl [vmem:[#allocation1 + $0x10] sm:$0xff pattern:$0x75316420] }
  0x4a   : > { %576 = vrot.lane.b32.xlu2 %v571_v20, %s1115_s10  ;;  %704 = vst [vmem:[#allocation1 + $0x10] ss:$2 sm:$0xff] %v633_v17  ;;  %s865_s10 = scalar_lea.sflag [#allocation3], %s188_s28 }
  0x50   : > { %v644_v25 = vld.sshfl [vmem:[#allocation1 + $0x8] sm:$0xff pattern:$0x75316420]  ;;  %v643_v26 = vld.sshfl [vmem:[#allocation1] sm:$0xff pattern:$0x75316420] }
  0x51   : > { %648 = vrot.lane.b32.xlu1 %v644_v25, %s1116_s11  ;;  %646 = vrot.lane.b32.xlu0 %v643_v26, %s1116_s11  ;;  %702 = vst [vmem:[#allocation1] ss:$2 sm:$0xff] %v1201_v0  ;;  %v707_v27 = vld.sshfl [vmem:[#allocation1 + $0x10] sm:$0xff pattern:$0x75316420] }
  0x52   : > { %650 = vrot.lane.b32.xlu2 %v645_v23, %s1116_s11  ;;  %772 = vst [vmem:[#allocation1 + $0x10] ss:$2 sm:$0xff] %v765_v24  ;;  %s1061_s11 = sshra.s32 %s881_s19, 4  ;;  %s1062_s11 = int_to_ptr.hbm [resolvable:$true] %s1061_s11 }
  0x53   : > { %p1068_p0 = scmp.lt.s32.totalorder %s1062_s11, %s1353_s4 }
  0x58   : > { %v706_v28 = vld.sshfl [vmem:[#allocation1 + $0x8] sm:$0xff pattern:$0x75316420]  ;;  %v705_v29 = vld.sshfl [vmem:[#allocation1] sm:$0xff pattern:$0x75316420] }
  0x59   : > { %710 = vrot.lane.b32.xlu1 %v706_v28, %s1117_s12  ;;  %708 = vrot.lane.b32.xlu0 %v705_v29, %s1117_s12  ;;  %770 = vst [vmem:[#allocation1] ss:$2 sm:$0xff] %v1201_v0  ;;  %v775_v30 = vld.sshfl [vmem:[#allocation1 + $0x10] sm:$0xff pattern:$0x75316420]  ;;  %v970_v0 = vld [vmem:[%s1350_s1 + $0x38] sm:$0xff]  ;;  %v196_v29 = vlaneseq }
  0x5a   : > { %712 = vrot.lane.b32.xlu2 %v707_v27, %s1117_s12  ;;  %s1063_s12 = scalar_lea.hbm %s1062_s11, 16 }
  0x5b   : > { %p1064_p11 = scmp.ne.s32.totalorder %s1062_s11, %s1063_s12  ;;  %p1069_p1 = scmp.lt.s32.totalorder %s1067_s20, %s1063_s12 }
  0x5d   : > { %p1065_p12 = pnand %p1064_p11, %p1183_p5  ;;  %p1070_p2 = por %p1069_p1, %p1068_p0 }
  0x5f   : > { %p1066_p13 = pneg %p1065_p12 }
  0x60   : > { %v774_v31 = vld.sshfl [vmem:[#allocation1 + $0x8] sm:$0xff pattern:$0x75316420]  ;;  %v773_v32 = vld.sshfl [vmem:[#allocation1] sm:$0xff pattern:$0x75316420] }
  0x61   : > { %778 = vrot.lane.b32.xlu1 %v774_v31, %s1118_s13  ;;  %776 = vrot.lane.b32.xlu0 %v773_v32, %s1118_s13  ;;  %v197_v32 = vand.u32 127, %v196_v29  ;;  %p1071_p3 = pnand %p1070_p2, %p1066_p13 }
  0x62   : > { %780 = vrot.lane.b32.xlu2 %v775_v30, %s1118_s13 }
  0x69   : > { %845 = vperm.xlu0 %1045, %v842_v59   ;;  %855 = vperm.xlu1 %1046, %v852_v60  }
  0x84   : > { %v367_v33 = vpop.permute.xlu2 %366 }
  0x8c   : > { %v365_v36 = vpop.permute.xlu2 %364 }
  0x8d   : > { %v370_v39 = vsel %vm368_vm2, %v365_v36, %v367_v33 }
  0x93   : > { %v242_v35 = vpop.permute.xlu0 %241 }
  0x94   : > { %v246_v37 = vpop.permute.xlu1 %245  ;;  %v447_v43 = vpop.permute.xlu2 %446 }
  0x9b   : > { %v244_v38 = vpop.permute.xlu0 %243 }
  0x9c   : > { %v248_v41 = vsel %vm247_vm3, %v242_v35, %v244_v38  ;;  %v249_v42 = vsel %vm247_vm3, %v244_v38, %v246_v37  ;;  %v509_v47 = vpop.permute.xlu2 %508  ;;  %v198_v35 = vadd.s32 128, %v197_v32 }
  0x9d   : > { %947 = vmatpush.msk.msra.mxu0 %vm254_vm0, %v248_v41  ;;  %949 = vmatpush.msk.msra.mxu1 %vm254_vm0, %v249_v42 }
  0x9e   : > { %948 = vmatmul.msk.f32.vlgmr.msra.gmra.mxu0 %vm250_vm1, %v946_v40  ;;  %950 = vmatmul.msk.f32.vlgmr.msra.gmra.mxu1 %vm250_vm1, %v946_v40  ;;  %v203_v40 = vand.u32 15, %v197_v32  ;;  %v210_v41 = vand.u32 15, %v198_v35 }
  0x9f   : > { %958 = vmatpush.msk.msrb.mxu1 %vm254_vm0, %v370_v39 }
  0xa0   : > { %vm1295_vm10 = vcmp.ge.s32.totalorder %v203_v40, 1  ;;  %vm1299_vm11 = vcmp.ge.s32.totalorder %v210_v41, 1  ;;  %vm1304_vm12 = vcmp.lt.s32.totalorder %v203_v40, 15  ;;  %vm226_vm13 = vcmp.lt.s32.totalorder %v210_v41, 15 }
  0xa3   : > { %v363_v44 = vpop.permute.xlu1 %362 }
  0xa4   : > { %v369_v46 = vsel %vm368_vm2, %v363_v44, %v365_v36  ;;  %v577_v53 = vpop.permute.xlu2 %576 }
  0xa5   : > { %956 = vmatpush.msk.msrb.mxu0 %vm254_vm0, %v369_v46 }
  0xa6   : > { %957 = vmatmul.msk.f32.vlgmr.msrb.gmra.mxu0 %vm250_vm1, %v955_v45  ;;  %959 = vmatmul.msk.f32.vlgmr.msrb.gmra.mxu1 %vm250_vm1, %v955_v45 }
  0xab   : > { %v445_v48 = vpop.permute.xlu1 %444  ;;  %v443_v49 = vpop.permute.xlu0 %442 }
  0xac   : > { %v449_v51 = vsel %vm448_vm4, %v443_v49, %v445_v48  ;;  %v450_v52 = vsel %vm448_vm4, %v445_v48, %v447_v43  ;;  %v651_v3 = vpop.permute.xlu2 %650 }
  0xad   : > { %962 = vmatpush.msk.msrb.mxu2 %vm254_vm0, %v449_v51  ;;  %964 = vmatpush.msk.msrb.mxu3 %vm254_vm0, %v450_v52 }
  0xae   : > { %963 = vmatmul.msk.f32.vlgmr.msrb.gmra.mxu2 %vm250_vm1, %v961_v50  ;;  %965 = vmatmul.msk.f32.vlgmr.msrb.gmra.mxu3 %vm250_vm1, %v961_v50  ;;  %v327_v23 = vpop.f32.mrf.mxu2  ;;  %v347_v24 = vpop.f32.mrf.mxu3 }
  0xb3   : > { %v507_v54 = vpop.permute.xlu1 %506  ;;  %v505_v55 = vpop.permute.xlu0 %504 }
  0xb4   : > { %v512_v57 = vsel %vm510_vm5, %v507_v54, %v509_v47  ;;  %v511_v58 = vsel %vm510_vm5, %v505_v55, %v507_v54  ;;  %v713_v9 = vpop.permute.xlu2 %712 }
  0xb5   : > { %966 = vmatpush.msk.msra.mxu0 %vm254_vm0, %v511_v58  ;;  %968 = vmatpush.msk.msra.mxu1 %vm254_vm0, %v512_v57 }
  0xb6   : > { %967 = vmatmul.msk.f32.vlgmr.msra.gmra.mxu0 %vm250_vm1, %v960_v56  ;;  %969 = vmatmul.msk.f32.vlgmr.msra.gmra.mxu1 %vm250_vm1, %v960_v56 }
  0xbb   : > { %v575_v62 = vpop.permute.xlu1 %574  ;;  %v573_v63 = vpop.permute.xlu0 %572 }
  0xbc   : > { %v580_v1 = vsel %vm578_vm6, %v575_v62, %v577_v53  ;;  %v579_v2 = vsel %vm578_vm6, %v573_v63, %v575_v62  ;;  %v781_v15 = vpop.permute.xlu2 %780 }
  0xbd   : > { %971 = vmatpush.msk.msra.mxu2 %vm254_vm0, %v579_v2  ;;  %973 = vmatpush.msk.msra.mxu3 %vm254_vm0, %v580_v1 }
  0xbe   : > { %972 = vmatmul.msk.f32.vlgmr.msra.gmra.mxu2 %vm250_vm1, %v970_v0  ;;  %974 = vmatmul.msk.f32.vlgmr.msra.gmra.mxu3 %vm250_vm1, %v970_v0 }
  0xc3   : > { %v649_v4 = vpop.permute.xlu1 %648  ;;  %v647_v5 = vpop.permute.xlu0 %646 }
  0xc4   : > { %v654_v7 = vsel %vm652_vm7, %v649_v4, %v651_v3  ;;  %v653_v8 = vsel %vm652_vm7, %v647_v5, %v649_v4 }
  0xc5   : > { %977 = vmatpush.msk.msrb.mxu0 %vm254_vm0, %v653_v8  ;;  %979 = vmatpush.msk.msrb.mxu1 %vm254_vm0, %v654_v7 }
  0xc6   : > { %978 = vmatmul.msk.f32.vlgmr.msrb.gmra.mxu0 %vm250_vm1, %v976_v6  ;;  %980 = vmatmul.msk.f32.vlgmr.msrb.gmra.mxu1 %vm250_vm1, %v976_v6 }
  0xcb   : > { %v711_v10 = vpop.permute.xlu1 %710  ;;  %v709_v11 = vpop.permute.xlu0 %708 }
  0xcc   : > { %v716_v13 = vsel %vm714_vm8, %v711_v10, %v713_v9  ;;  %v715_v14 = vsel %vm714_vm8, %v709_v11, %v711_v10 }
  0xcd   : > { %981 = vmatpush.msk.msrb.mxu2 %vm254_vm0, %v715_v14  ;;  %983 = vmatpush.msk.msrb.mxu3 %vm254_vm0, %v716_v13 }
  0xce   : > { %982 = vmatmul.msk.f32.vlgmr.msrb.gmra.mxu2 %vm250_vm1, %v975_v12  ;;  %984 = vmatmul.msk.f32.vlgmr.msrb.gmra.mxu3 %vm250_vm1, %v975_v12 }
  0xd3   : > { %v779_v16 = vpop.permute.xlu1 %778  ;;  %v777_v17 = vpop.permute.xlu0 %776 }
  0xd4   : > { %v784_v19 = vsel %vm782_vm9, %v779_v16, %v781_v15  ;;  %v783_v20 = vsel %vm782_vm9, %v777_v17, %v779_v16 }
  0xd5   : > { %986 = vmatpush.msk.msra.mxu0 %vm254_vm0, %v783_v20  ;;  %988 = vmatpush.msk.msra.mxu1 %vm254_vm0, %v784_v19 }
  0xd6   : > { %987 = vmatmul.msk.f32.vlgmr.msra.gmra.mxu0 %vm250_vm1, %v985_v18  ;;  %989 = vmatmul.msk.f32.vlgmr.msra.gmra.mxu1 %vm250_vm1, %v985_v18 }
  0xdb   : > { %v846_v1 = vpop.permute.xlu0 %845  ;;  %v856_v4 = vpop.permute.xlu1 %855 }
 0x11b   : > { %v276_v21 = vpop.f32.mrf.mxu0  ;;  %v296_v22 = vpop.f32.mrf.mxu1 }
 0x11c   : > { %v328_v38 = vadd.f32 %v327_v23, %v276_v21  ;;  %v348_v39 = vadd.f32 %v347_v24, %v296_v22 }
 0x123   : > { %v395_v25 = vpop.f32.mrf.mxu0  ;;  %v415_v26 = vpop.f32.mrf.mxu1 }
 0x124   : > { %v418_v44 = vadd.f32 %v395_v25, %v328_v38  ;;  %v419_v45 = vadd.f32 %v415_v26, %v348_v39 }
 0x126   : > { %v424_v57 = vsel %vm1295_vm10, %v418_v44, 0.0  ;;  %v425_v58 = vsel %vm1299_vm11, %v419_v45, 0.0 }
 0x131   : > { %v475_v27 = vpop.f32.mrf.mxu2  ;;  %v495_v28 = vpop.f32.mrf.mxu3 }
 0x133   : > { %v537_v30 = vpop.f32.mrf.mxu0  ;;  %v557_v31 = vpop.f32.mrf.mxu1 }
 0x134   : > { %v538_v42 = vadd.f32 %v537_v30, %v475_v27  ;;  %v558_v43 = vadd.f32 %v557_v31, %v495_v28 }
 0x141   : > { %v605_v33 = vpop.f32.mrf.mxu2  ;;  %v625_v34 = vpop.f32.mrf.mxu3 }
 0x142   : > { %v628_v48 = vadd.f32 %v605_v33, %v538_v42  ;;  %v629_v49 = vadd.f32 %v625_v34, %v558_v43 }
 0x143   : > { %v679_v36 = vpop.f32.mrf.mxu0  ;;  %v699_v37 = vpop.f32.mrf.mxu1 }
 0x144   : > { %v630_v61 = vadd.f32 %v628_v48, %v424_v57  ;;  %v631_v62 = vadd.f32 %v629_v49, %v425_v58 }
 0x151   : > { %v741_v50 = vpop.f32.mrf.mxu2  ;;  %v761_v51 = vpop.f32.mrf.mxu3 }
 0x152   : > { %v742_v52 = vadd.f32 %v741_v50, %v679_v36  ;;  %v762_v53 = vadd.f32 %v761_v51, %v699_v37 }
 0x153   : > { %v809_v55 = vpop.f32.mrf.mxu0  ;;  %v829_v56 = vpop.f32.mrf.mxu1 }
 0x154   : > { %v832_v59 = vadd.f32 %v809_v55, %v742_v52  ;;  %v833_v60 = vadd.f32 %v829_v56, %v762_v53 }
 0x156   : > { %v838_v63 = vsel %vm1304_vm12, %v832_v59, 0.0  ;;  %v839_v0 = vsel %vm226_vm13, %v833_v60, 0.0 }
 0x157   : > { %v841_v2 = vadd.f32 %v839_v0, %v631_v62  ;;  %v840_v3 = vadd.f32 %v838_v63, %v630_v61 }
 0x159   : > { %v848_v5 = vadd.f32 %v846_v1, %v840_v3  ;;  %v849_v6 = vadd.f32 %v846_v1, %v841_v2 }
 0x15b   : > { %vm850_vm14 = vcmp.ge.f32.partialorder %v848_v5, 0.0  ;;  %vm851_vm15 = vcmp.ge.f32.partialorder %v849_v6, 0.0  ;;  %v858_v7 = vmul.f32 %v856_v4, %v848_v5  ;;  %v859_v8 = vmul.f32 %v856_v4, %v849_v6 }
 0x15d   : > { %v860_v9 = vsel %vm850_vm14, %v848_v5, %v858_v7  ;;  %v861_v10 = vsel %vm851_vm15, %v849_v6, %v859_v8 }
 0x15e   : > { %862 = vst [vmem:[%s190_s8] sm:$0xff] %v860_v9 }
 0x15f   : > { %863 = vst [vmem:[%s190_s8 + $0x8] sm:$0xff] %v861_v10 }
 0x160   : > { %1074 = shalt.err (!%p1071_p3)
}
 0x161   : > { %997 = dma.vmem_to_hbm [thread:$0]  (%p1183_p5), %s879_s9, 256, %s881_s19, %s865_s10  }
 0x162 PF: > { %p1003_p4 = scmp.ge.s32.totalorder %s1109_s18, 2  ;;  %s892_s27 = sand.u32 1, %s1097_s15  }
 0x163   : > { %s893_s28 = scalar_lea.sflag [#allocation3], %s892_s27 }
 0x164   : > { %p1000_p7 = pnand %p1003_p4, %p1187_p6 }
 0x166   : > { %p1001_p8 = pneg %p1000_p7 }
 0x168   : > { %1092 = dma.done.wait (%p1001_p8), %s893_s28, 256  }
 0x169   : > { %1094 = vsyncadd (%p1001_p8), %s893_s28, 4294967040  ;;  %p14_p9 = scmp.ge.s32.totalorder %s1170_s21, 4   ;;  %s1362_s15 = smov %s1101_s16 }
 0x16a   : > { %s1363_s16 = smov %s1105_s17  ;;  %s1364_s17 = smov %s1181_s24 }
 0x16b   : > { %s1365_s18 = smov %s1170_s21  ;;  %16 = sbr.rel (!%p14_p9) target bundleno = 3 (0x3), region = 87 }
 0x170   :  { %899 = vsyncpa [#allocation3], 1 }
 0x171   :  { %901 = vsyncpa [#allocation3 + $0x1], 1 }

</bundles_post_ra>
